<compile_context>
chip_gen: v6e
topology: v6e:2x2x1
jax: 0.10.0
libtpu: 0.0.40
codegen_flags: <defaults>
</compile_context>

<pallas_src>
import jax
import jax.numpy as jnp
import numpy as np
from jax import lax
from jax.experimental import pallas as pl
from jax.experimental.pallas import tpu as pltpu


def _fnet_fourier_kernel(x_ref, w1_ref, w2_ref, o_ref, y_ref):
    # x_ref : (bt, S, H)   compute dtype (bf16)
    # w1_ref: (2S, S)      [C_S ; S_S]
    # w2_ref: (2H, H)      [C_H ; -S_H]
    # o_ref : (bt, S, H)   output dtype
    # y_ref : (S, 2H)      VMEM scratch (compute dtype), reused per batch element
    bt, s, h = x_ref.shape

    def body(b, carry):
        # Stage 1 (S-side contraction): one GEMM with M = 2S, K = S, N = H.
        y = jnp.dot(w1_ref[...], x_ref[b], preferred_element_type=jnp.float32)  # (2S, H)
        # Restack the cos/sin halves into the two lane-halves of the scratch
        # (plain stores, no cross-lane shuffles).
        y_ref[:, :h] = y[:s].astype(y_ref.dtype)
        y_ref[:, h:] = y[s:].astype(y_ref.dtype)
        # Stage 2 (H-side contraction): one GEMM with K = 2H, written directly to o_ref[b]
        # so no (bt*S, H) f32 temporary is ever materialized.
        o_ref[b] = jnp.dot(y_ref[...], w2_ref[...],
                           preferred_element_type=jnp.float32).astype(o_ref.dtype)
        return carry

    # fori_loop(unroll=True) bounds live ranges to one iteration while keeping LLO visibility.
    lax.fori_loop(0, bt, body, None, unroll=True)


def _fused_dft_basis(seq_len: int, hidden: int, dtype):
    """W1 = [C_S; S_S] (2S,S), W2 = [C_H; -S_H] (2H,H), built in f64 then cast."""
    ks = np.arange(seq_len)
    ang_s = 2.0 * np.pi * np.outer(ks, ks) / seq_len
    kh = np.arange(hidden)
    ang_h = 2.0 * np.pi * np.outer(kh, kh) / hidden
    w1 = np.concatenate([np.cos(ang_s), np.sin(ang_s)], axis=0)    # (2S, S)
    w2 = np.concatenate([np.cos(ang_h), -np.sin(ang_h)], axis=0)   # (2H, H)
    return jnp.asarray(w1, dtype=dtype), jnp.asarray(w2, dtype=dtype)


def _vmem_params():
    """(vmem_limit_bytes, per-step tile budget) derived from the chip's physical VMEM."""
    phys = None
    try:
        phys = int(getattr(pltpu.get_tpu_info(), "vmem_capacity_bytes", 0)) or None
    except Exception:
        phys = None
    if phys is None or phys <= 0:
        phys = 64 * 1024 * 1024  # conservative default: assume a v7x-class 64 MiB part
    # v5e/v6e (128 MiB): limit ~100 MiB, budget ~77 MiB.  v7x (64 MiB): limit ~51, budget ~38.
    vmem_limit = min(int(phys * 0.80), 100 * 1024 * 1024)
    tile_budget = min(int(phys * 0.60), 88 * 1024 * 1024)
    return vmem_limit, tile_budget


def _pick_batch_tile(batch: int, seq_len: int, hidden: int,
                     cd_size: int, out_size: int, tile_budget: int,
                     max_tile: int = 16) -> int:
    """Largest divisor of `batch` whose per-step VMEM footprint fits `tile_budget`.

    Footprint model (bytes):
      x block (2-buf, compute dtype)  : 2 * bt*S*H * cd_size
      out block (2-buf, out dtype)    : 2 * bt*S*H * out_size
      W1 / W2 (single-buffered)       : 4*S^2 + 4*H^2   (bf16)
      y scratch + f32 GEMM temps      : ~16*S*H slop
    Prefers keeping >= 2 grid steps (v7x megacore) when that costs at most a 2x smaller tile.
    """
    def footprint(bt):
        return (bt * seq_len * hidden * (2 * cd_size + 2 * out_size)
                + 4 * seq_len * seq_len + 4 * hidden * hidden
                + 16 * seq_len * hidden)

    divisors = [d for d in range(1, min(batch, max_tile) + 1) if batch % d == 0]
    fitting = [d for d in divisors if footprint(d) <= tile_budget]
    if not fitting:
        return 1
    best = max(fitting)
    if batch >= 2 and batch // best < 2:
        multi = [d for d in fitting if batch // d >= 2]
        if multi and 2 * max(multi) >= best:
            best = max(multi)
    return best


def fnet_basic_fourier_transform(hidden_states: jax.Array,
                                 *,
                                 batch_tile: int | None = None,
                                 compute_dtype=jnp.bfloat16,
                                 out_dtype=None):
    """Returns (real part of fftn(hidden_states, axes=(1, 2)),) like the torch module."""
    B, S, H = hidden_states.shape
    out_dtype = hidden_states.dtype if out_dtype is None else out_dtype
    cd_size = jnp.dtype(compute_dtype).itemsize
    out_size = jnp.dtype(out_dtype).itemsize

    vmem_limit, tile_budget = _vmem_params()
    bt = (_pick_batch_tile(B, S, H, cd_size, out_size, tile_budget)
          if batch_tile is None else batch_tile)
    assert B % bt == 0, "batch_tile must divide batch"

    w1, w2 = _fused_dft_basis(S, H, compute_dtype)
    x = hidden_states.astype(compute_dtype)

    # Advisory cost hint: 2 fused GEMMs per batch element -> 4*B*(S^2*H + S*H^2) flops.
    flops = 4 * B * (S * S * H + S * H * H)
    bytes_accessed = (x.size * x.dtype.itemsize
                      + w1.size * w1.dtype.itemsize
                      + w2.size * w2.dtype.itemsize
                      + B * S * H * out_size)

    out = pl.pallas_call(
        _fnet_fourier_kernel,
        out_shape=jax.ShapeDtypeStruct((B, S, H), out_dtype),
        grid_spec=pltpu.PrefetchScalarGridSpec(
            num_scalar_prefetch=0,
            grid=(B // bt,),
            in_specs=[
                # per-step batch tile of activations
                pl.BlockSpec((bt, S, H), lambda i: (i, 0, 0)),
                # constant DFT bases: index_map never changes -> single buffer
                pl.BlockSpec((2 * S, S), lambda i: (0, 0),
                             pipeline_mode=pl.Buffered(1)),
                pl.BlockSpec((2 * H, H), lambda i: (0, 0),
                             pipeline_mode=pl.Buffered(1)),
            ],
            out_specs=pl.BlockSpec((bt, S, H), lambda i: (i, 0, 0)),
            scratch_shapes=[pltpu.VMEM((S, 2 * H), compute_dtype)],
        ),
        compiler_params=pltpu.CompilerParams(
            dimension_semantics=("parallel",),
            vmem_limit_bytes=vmem_limit,
        ),
        cost_estimate=pl.CostEstimate(flops=flops,
                                      transcendentals=0,
                                      bytes_accessed=bytes_accessed),
    )(x, w1, w2)

    return (out,)


if __name__ == "__main__":
    key = jax.random.PRNGKey(0)
    k0, k1 = jax.random.split(key)

    # Small shape consistent with the module's (batch, seq_len, hidden) layout.
    B, S, H = 2, 8, 32
    x = jax.random.normal(k0, (B, S, H), dtype=jnp.float32)
    (out,) = fnet_basic_fourier_transform(x)
    out = jax.block_until_ready(out)
    ref = jnp.fft.fftn(x, axes=(1, 2)).real
    # bf16 inputs / intermediates with f32 accumulation -> loose tolerance.
    np.testing.assert_allclose(np.asarray(out), np.asarray(ref), rtol=3e-2, atol=1.0)

    # Second small shape exercising the bt>1 batch-tiled path and a lane-dense hidden dim.
    B2, S2, H2 = 4, 16, 128
    x2 = jax.random.normal(k1, (B2, S2, H2), dtype=jnp.float32)
    (out2,) = fnet_basic_fourier_transform(x2)
    out2 = jax.block_until_ready(out2)
    ref2 = jnp.fft.fftn(x2, axes=(1, 2)).real
    np.testing.assert_allclose(np.asarray(out2), np.asarray(ref2), rtol=3e-2, atol=1.0)

    print("KERNEL_OK")
</pallas_src>

<mosaic_0001>
module attributes {stable_mosaic.version = 11 : i64} {
  func.func @_fnet_fourier_kernel(%arg0: i32, %arg1: memref<1x8x32xbf16, #tpu.memory_space<vmem>>, %arg2: memref<16x8xbf16, #tpu.memory_space<vmem>>, %arg3: memref<64x32xbf16, #tpu.memory_space<vmem>>, %arg4: memref<1x8x32xf32, #tpu.memory_space<vmem>>, %arg5: memref<8x64xbf16, #tpu.memory_space<vmem>>) attributes {dimension_semantics = [#tpu.dimension_semantics<parallel>], iteration_bounds = array<i64: 2>, scalar_prefetch = 0 : i64, scratch_operands = 1 : i64, tpu.core_type = #tpu.core_type<tc>, window_params = [{transform_indices = @transform_0, window_bounds = array<i64: 1, 8, 32>}, {pipeline_mode = #tpu.pipeline_mode<synchronous>, transform_indices = @transform_1, window_bounds = array<i64: 16, 8>}, {pipeline_mode = #tpu.pipeline_mode<synchronous>, transform_indices = @transform_2, window_bounds = array<i64: 64, 32>}, {transform_indices = @transform_3, window_bounds = array<i64: 1, 8, 32>}]} {
    %c0_i32 = arith.constant 0 : i32
    %c0 = arith.constant 0 : index
    %c0_0 = arith.constant 0 : index
    %0 = vector.load %arg2[%c0, %c0_0] : memref<16x8xbf16, #tpu.memory_space<vmem>>, vector<16x8xbf16>
    %1 = arith.index_cast %c0_i32 : i32 to index
    %c0_1 = arith.constant 0 : index
    %c0_2 = arith.constant 0 : index
    %2 = vector.load %arg1[%1, %c0_1, %c0_2] : memref<1x8x32xbf16, #tpu.memory_space<vmem>>, vector<1x8x32xbf16>
    %3 = vector.shape_cast %2 : vector<1x8x32xbf16> to vector<8x32xbf16>
    %cst = arith.constant dense<0.000000e+00> : vector<16x32xf32>
    %4 = tpu.matmul %0, %3, %cst {dimension_numbers = #tpu.dot_dimension_numbers<[1], [0], [0], [1], [0, 0, 1, 1], [], []>} : vector<16x8xbf16>, vector<8x32xbf16>, vector<16x32xf32> -> vector<16x32xf32>
    %5 = vector.extract_strided_slice %4 {offsets = [0, 0], sizes = [8, 32], strides = [1, 1]} : vector<16x32xf32> to vector<8x32xf32>
    %6 = arith.truncf %5 : vector<8x32xf32> to vector<8x32xbf16>
    %c0_3 = arith.constant 0 : index
    %c0_4 = arith.constant 0 : index
    %7 = vector.load %arg5[%c0_3, %c0_4] : memref<8x64xbf16, #tpu.memory_space<vmem>>, vector<8x32xbf16>
    tpu.vector_store %arg5[%c0_3, %c0_4], %6 {strides = array<i32>} : memref<8x64xbf16, #tpu.memory_space<vmem>>, vector<8x32xbf16>,
    %8 = vector.extract_strided_slice %4 {offsets = [8, 0], sizes = [8, 32], strides = [1, 1]} : vector<16x32xf32> to vector<8x32xf32>
    %9 = arith.truncf %8 : vector<8x32xf32> to vector<8x32xbf16>
    %c0_5 = arith.constant 0 : index
    %c32 = arith.constant 32 : index
    %10 = vector.load %arg5[%c0_5, %c32] : memref<8x64xbf16, #tpu.memory_space<vmem>>, vector<8x32xbf16>
    tpu.vector_store %arg5[%c0_5, %c32], %9 {strides = array<i32>} : memref<8x64xbf16, #tpu.memory_space<vmem>>, vector<8x32xbf16>,
    %c0_6 = arith.constant 0 : index
    %c0_7 = arith.constant 0 : index
    %11 = vector.load %arg5[%c0_6, %c0_7] : memref<8x64xbf16, #tpu.memory_space<vmem>>, vector<8x64xbf16>
    %c0_8 = arith.constant 0 : index
    %c0_9 = arith.constant 0 : index
    %12 = vector.load %arg3[%c0_8, %c0_9] : memref<64x32xbf16, #tpu.memory_space<vmem>>, vector<64x32xbf16>
    %cst_10 = arith.constant dense<0.000000e+00> : vector<8x32xf32>
    %13 = tpu.matmul %11, %12, %cst_10 {dimension_numbers = #tpu.dot_dimension_numbers<[1], [0], [0], [1], [0, 0, 1, 1], [], []>} : vector<8x64xbf16>, vector<64x32xbf16>, vector<8x32xf32> -> vector<8x32xf32>
    %14 = arith.index_cast %c0_i32 : i32 to index
    %c0_11 = arith.constant 0 : index
    %c0_12 = arith.constant 0 : index
    %15 = vector.load %arg4[%14, %c0_11, %c0_12] : memref<1x8x32xf32, #tpu.memory_space<vmem>>, vector<1x8x32xf32>
    %16 = vector.shape_cast %15 : vector<1x8x32xf32> to vector<8x32xf32>
    %17 = vector.shape_cast %13 : vector<8x32xf32> to vector<1x8x32xf32>
    tpu.vector_store %arg4[%14, %c0_11, %c0_12], %17 {strides = array<i32>} : memref<1x8x32xf32, #tpu.memory_space<vmem>>, vector<1x8x32xf32>,
    %c1_i32 = arith.constant 1 : i32
    return
  }
  func.func @transform_0(%arg0: i32) -> (i32, i32, i32) {
    %c0_i32 = arith.constant 0 : i32
    %c0_i32_0 = arith.constant 0 : i32
    %c0_i32_1 = arith.constant 0 : i32
    return %arg0, %c0_i32, %c0_i32_0 : i32, i32, i32
  }
  func.func @transform_1(%arg0: i32) -> (i32, i32) {
    %c0_i32 = arith.constant 0 : i32
    %c0_i32_0 = arith.constant 0 : i32
    %c0_i32_1 = arith.constant 0 : i32
    return %c0_i32, %c0_i32_0 : i32, i32
  }
  func.func @transform_2(%arg0: i32) -> (i32, i32) {
    %c0_i32 = arith.constant 0 : i32
    %c0_i32_0 = arith.constant 0 : i32
    %c0_i32_1 = arith.constant 0 : i32
    return %c0_i32, %c0_i32_0 : i32, i32
  }
  func.func @transform_3(%arg0: i32) -> (i32, i32, i32) {
    %c0_i32 = arith.constant 0 : i32
    %c0_i32_0 = arith.constant 0 : i32
    %c0_i32_1 = arith.constant 0 : i32
    return %arg0, %c0_i32, %c0_i32_0 : i32, i32, i32
  }
}

</mosaic_0001>

<bundles_post_ra>
// kernel: tpu_custom_call.1
= control target key start
LH: loop header
LB: loop body
LE: loop exit
PB: predicated region body
PF: predicated region fallthrough
CT: control target
= control target key end

     0   :  { %8 = vsyncpa [#allocation4], 0  ;;  %s679_s0 = inlined_call_operand.vmem [shape: bf16[2,8,32], index: 0, kind: input, shape index: {}]   ;;  %s680_s1 = inlined_call_operand.vmem [shape: bf16[16,8], index: 1, kind: input, shape index: {}]   ;;  %s681_s2 = inlined_call_operand.vmem [shape: bf16[64,32], index: 2, kind: input, shape index: {}]   ;;  %s682_s3 = inlined_call_operand.hbm [shape: f32[2,8,32], index: 3, kind: output, shape index: {}]  }
   0x1   :  { %10 = vsyncpa [#allocation4 + $0x1], 0  ;;  %s565_s12 = smov 0   ;;  %s567_s13 = smov 0  }
   0x2   :  { %s569_s14 = smov 0   ;;  %s571_s15 = smov 0  }
   0x3 LB: > { %s586_s16 = sadd.s32 4294967295, %s539_s15   ;;  %s388_s17 = sadd.s32 4294967294, %s539_s15   ;;  %s539_s15 = sphi %s571_s15, %s688_s15   ;;  %s535_s14 = sphi %s569_s14, %s687_s14   ;;  %s531_s13 = sphi %s567_s13, %s686_s13   ;;  %s527_s12 = sphi %s565_s12, %s685_s12  }
   0x4   : > { %s590_s18 = sadd.s32 1, %s539_s15   ;;  %s91_s19 = sadd.s32 1, %s535_s14 }
   0x5   : > { %s88_s20 = ssub.s32 %s539_s15, %s590_s18  ;;  %p101_p0 = scmp.ne.s32.totalorder %s535_s14, %s531_s13 }
   0x6   : > { %p89_p1 = scmp.eq.s32.totalorder %s88_s20, 0  ;;  %p102_p2 = scmp.eq.s32.totalorder %s586_s16, 1 }
   0x7   : > { %p107_p3 = scmp.ne.s32.totalorder %s531_s13, %s527_s12  ;;  %p108_p4 = scmp.eq.s32.totalorder %s388_s17, 1 }
   0x8   : > { %s601_s21 = scalar_select %p89_p1, %s535_s14, %s91_s19  }
   0x9   : > { %p603_p5 = por %p102_p2, %p101_p0  ;;  %p607_p6 = por %p108_p4, %p107_p3 }
   0xa   : > { %p391_p7 = scmp.ge.s32.totalorder %s539_s15, 1  ;;  %p139_p8 = scmp.lt.s32.totalorder %s539_s15, 3 }
   0xc   : > { %p140_p9 = pnand %p391_p7, %p139_p8 }
   0xd   : > { %p162_p10 = scmp.lt.s32.totalorder (!%p140_p9), %s586_s16, 1  ;;  %s543_s17 = smov (!%p140_p9), 32  }
   0xe   : > { %143 = sbr.rel (%p140_p9) target bundleno = 559 (0x22f), region = 32  ;;  %s159_s19 = sand.u32 (!%p140_p9), 1, %s531_s13  }
   0xf   : > { %s392_s20 = sshll.u32 (!%p140_p9), %s159_s19, 3  ;;  %s316_s30 = scalar_lea.sflag (!%p140_p9), [#allocation4], %s159_s19 }
  0x13   : > { %v541_v0 = vmov 0.0   ;;  %vm542_vm0 = vmmov 0   ;;  %s163_s24 = scalar_select %p162_p10, %s586_s16, 1  ;;  %vm179_vm1 = vcmask 1043456   ;;  %v474_v3 = vld [vmem:[%s680_s1] sm:$0xff]   ;;  %vm175_vm2 = vcmask 64512  }
  0x14   : > { %414 = vmatprep.subr.bf16.mxu0 %v541_v0  ;;  %416 = vmatprep.mubr.msk.bf16.mxu0 %vm542_vm0, %v541_v0  ;;  %v475_v4 = vld [vmem:[%s681_s2 + $0x18] sm:$0xff]   ;;  %v476_v5 = vld [vmem:[%s681_s2 + $0x10] sm:$0xff]   ;;  %v477_v6 = vld [vmem:[%s681_s2 + $0x8] sm:$0xff]   ;;  %vm225_vm3 = vcmask 257024   ;;  %vm234_vm4 = vcmask 519424   ;;  %vm269_vm5 = vcmask 523264  }
  0x15   : > { %420 = vmatprep.subr.bf16.mxu1 %v541_v0  ;;  %428 = vmatprep.mubr.msk.bf16.mxu1 %vm542_vm0, %v541_v0  ;;  %s393_s25 = sshll.u32 %s163_s24, 2  ;;  %v478_v7 = vld [vmem:[%s681_s2] sm:$0xff]   ;;  %s403_s24 = sshll.u32 %s586_s16, 7  ;;  %vm313_vm6 = vcmask 261120  }
  0x16   : > { %s165_s28 = scalar_lea.vmem %s679_s0, %s393_s25  ;;  %421 = vmatpush3.bf16.msra.mxu1 %v475_v4  ;;  %s161_s25 = scalar_lea.vmem [#allocation3], %s392_s20 }
  0x17   : > { %v169_v1 = vld [vmem:[%s165_s28] sm:$0xf]  ;;  %422 = vmatprep.subr.bf16.mxu1 %v541_v0  ;;  %s329_s26 = sshll.u32 %s161_s25, 4  ;;  %s638_s29 = scalar_lea.hbm %s682_s3, %s403_s24  ;;  %s640_s26 = int_to_ptr.vmem [resolvable:$true] %s329_s26 }
  0x18   : > { %v181_v2 = vsel %vm179_vm1, %v169_v1, 0  ;;  %s479_s4 = scalar_lea.vmem %s640_s26, 128  ;;  %s544_s16 = smov [#allocation3]  }
  0x19   : > { %415 = vmatpush3.bf16.msra.mxu0 %v181_v2  ;;  %p480_p11 = scmp.ne.s32.totalorder %s640_s26, %s479_s4  ;;  %s483_s5 = sshll.u32 %s544_s16, 4  ;;  %s484_s5 = int_to_ptr.vmem [resolvable:$false] %s483_s5 }
  0x1a   : > { %423 = vmatpush3.bf16.msra.mxu1 %v476_v5  ;;  %s485_s6 = scalar_lea.vmem %s484_s5, 256  ;;  %p486_p0 = scmp.lt.s32.totalorder %s640_s26, %s484_s5 }
  0x1b   : > { %424 = vmatprep.subr.bf16.mxu1 %v541_v0  ;;  %p481_p12 = pnand %p480_p11, %p603_p5  ;;  %p487_p1 = scmp.lt.s32.totalorder %s485_s6, %s479_s4 }
  0x1c   : > { %417 = vmatmul.mubr.msk.bf16.vlgmr.msra.gmra.mxu0 %vm175_vm2, %v474_v3 }
  0x1d   : > { %p482_p13 = pneg %p481_p12  ;;  %p488_p2 = por %p487_p1, %p486_p0 }
  0x1e   : > { %425 = vmatpush3.bf16.msra.mxu1 %v477_v6 }
  0x1f   : > { %426 = vmatprep.subr.bf16.mxu1 %v541_v0  ;;  %p489_p3 = pnand %p488_p2, %p482_p13 }
  0x22   : > { %427 = vmatpush3.bf16.msra.mxu1 %v478_v7 }
  0xdc   : > { %v217_v8 = vpop.f32.mrf.mxu0 }
  0xdd   : > { %v224_v9 = vpack.c.bf16 %v217_v8, %v217_v8 }
  0xde   : > { %v418_v10 = vpop.f32.mrf.mxu0 }
  0xdf   : > { %226 = vst.msk [vmem:[#allocation2] sm:$0xf] %vm225_vm3, %v224_v9 }
  0xe0   : > { %v220_v11 = vpop.f32.mrf.mxu0 }
  0xe1   : > { %v406_v12 = vpack.c.bf16 %v220_v11, %v220_v11 }
  0xe2   : > { %v419_v13 = vpop.f32.mrf.mxu0 }
  0xe3   : > { %231 = vrot.lane.b32.xlu0 %v406_v12, %s543_s17 }
 0x155   : > { %v232_v14 = vpop.permute.xlu0 %231 }
 0x156   : > { %235 = vst.msk [vmem:[#allocation2] sm:$0xf] %vm234_vm4, %v232_v14 }
 0x15d   : > { %v236_v15 = vld [vmem:[#allocation2] sm:$0xf] }
 0x15e   : > { %429 = vmatmul.mubr.msk.bf16.vlgmr.msra.gmra.mxu1 %vm269_vm5, %v236_v15 }
 0x21e   : > { %v307_v16 = vpop.f32.mrf.mxu1 }
 0x21f   : > { %314 = vst.msk [vmem:[%s161_s25] sm:$0xff] %vm313_vm6, %v307_v16 }
 0x220   : > { %v430_v17 = vpop.f32.mrf.mxu1 }
 0x221   : > { %492 = shalt.err (!%p489_p3)
}
 0x222   : > { %s493_s7 = scalar_lea.hbm %s638_s29, 128  ;;  %s497_s10 = scalar_lea.hbm %s682_s3, 256 }
 0x223   : > { %p494_p4 = scmp.ne.s32.totalorder %s638_s29, %s493_s7  ;;  %p498_p9 = scmp.lt.s32.totalorder %s638_s29, %s682_s3 }
 0x224   : > { %p499_p10 = scmp.lt.s32.totalorder %s497_s10, %s493_s7 }
 0x225   : > { %p495_p7 = pnand %p494_p4, %p603_p5 }
 0x226   : > { %p500_p11 = por %p499_p10, %p498_p9 }
 0x227   : > { %p496_p8 = pneg %p495_p7 }
 0x229   : > { %p501_p12 = pnand %p500_p11, %p496_p8 }
 0x22b   : > { %504 = shalt.err (!%p501_p12)
}
 0x22c   : > { %432 = dma.vmem_to_hbm [thread:$0]  (%p603_p5), %s640_s26, 128, %s638_s29, %s316_s30   ;;  %v310_v18 = vpop.f32.mrf.mxu1 }
 0x22e   : > { %v431_v19 = vpop.f32.mrf.mxu1 }
 0x22f PF: > { %p438_p13 = scmp.ge.s32.totalorder %s539_s15, 2  ;;  %s341_s19 = sand.u32 1, %s527_s12  }
 0x230   : > { %s342_s20 = scalar_lea.sflag [#allocation4], %s341_s19 }
 0x231   : > { %p435_p0 = pnand %p438_p13, %p607_p6 }
 0x233   : > { %p436_p1 = pneg %p435_p0 }
 0x235   : > { %522 = dma.done.wait (%p436_p1), %s342_s20, 128  }
 0x236   : > { %524 = vsyncadd (%p436_p1), %s342_s20, 4294967168  ;;  %p13_p5 = scmp.ge.s32.totalorder %s590_s18, 4   ;;  %s685_s12 = smov %s531_s13 }
 0x237   : > { %s686_s13 = smov %s535_s14  ;;  %s687_s14 = smov %s601_s21 }
 0x238   : > { %s688_s15 = smov %s590_s18  ;;  %15 = sbr.rel (!%p13_p5) target bundleno = 3 (0x3), region = 67 }
 0x23d   :  { %347 = vsyncpa [#allocation4], 1 }
 0x23e   :  { %349 = vsyncpa [#allocation4 + $0x1], 1 }

</bundles_post_ra>
